<compile_context>
chip_gen: v6e
topology: v6e:2x2x1
jax: 0.10.0
libtpu: 0.0.40
codegen_flags: <defaults>
</compile_context>

<pallas_src>
import functools

import jax
import jax.numpy as jnp
from jax.experimental import pallas as pl
from jax.experimental.pallas import tpu as pltpu

LANE = 128      # lane width: pad hidden/output dims to a multiple of this
SUBLANE = 8     # sublane count: minimum batch-tile granularity


def _round_up(n, m):
    return ((n + m - 1) // m) * m


def mlp_kernel(x_ref, w1_ref, b1_ref, w2_ref, b2_ref, w3_ref, b3_ref, o_ref):
    # Whole MLP hot path (3 MXU matmuls + bias + ReLU epilogue) per batch tile.
    x = x_ref[...]
    h1 = jnp.dot(x, w1_ref[...], preferred_element_type=jnp.float32) + b1_ref[...]
    h1 = jnp.maximum(h1, 0.0)
    h2 = jnp.dot(h1, w2_ref[...], preferred_element_type=jnp.float32) + b2_ref[...]
    h2 = jnp.maximum(h2, 0.0)
    h3 = jnp.dot(h2, w3_ref[...], preferred_element_type=jnp.float32) + b3_ref[...]
    o_ref[...] = jnp.maximum(h3, 0.0)


def _pad_params(params, hidden, out_dim):
    """Zero-pad weights/biases to lane-aligned widths (exact math preserved)."""
    w1, b1, w2, b2, w3, b3 = params
    hpad = max(_round_up(hidden, LANE), LANE)
    opad = max(_round_up(out_dim, LANE), LANE)
    in_dim = w1.shape[0]

    w1p = jnp.zeros((in_dim, hpad), jnp.float32).at[:, :hidden].set(w1)
    b1p = jnp.zeros((1, hpad), jnp.float32).at[:, :hidden].set(b1)
    w2p = jnp.zeros((hpad, hpad), jnp.float32).at[:hidden, :hidden].set(w2)
    b2p = jnp.zeros((1, hpad), jnp.float32).at[:, :hidden].set(b2)
    w3p = jnp.zeros((hpad, opad), jnp.float32).at[:hidden, :out_dim].set(w3)
    b3p = jnp.zeros((1, opad), jnp.float32).at[:, :out_dim].set(b3)
    return (w1p, b1p, w2p, b2p, w3p, b3p), hpad, opad


@functools.partial(jax.jit, static_argnames=("hidden",))
def neural_network_forward(x, params, *, hidden):
    """x: [B, 28, 28] float32. Returns [B, 10] (ReLU'd, as in the module)."""
    out_dim = 10
    in_dim = 28 * 28
    B = x.shape[0]
    x2d = x.reshape(B, in_dim).astype(jnp.float32)  # nn.Flatten

    (w1, b1, w2, b2, w3, b3), hpad, opad = _pad_params(params, hidden, out_dim)

    # Batch tiling: at least one sublane group, at most 512 rows (f32) so the
    # double-buffered x tile stays tiny relative to scoped VMEM on all chips.
    tile_b = min(512, _round_up(B, SUBLANE))
    b_pad = _round_up(B, tile_b)
    if b_pad != B:
        x2d = jnp.pad(x2d, ((0, b_pad - B), (0, 0)))

    grid = (b_pad // tile_b,)

    out = pl.pallas_call(
        mlp_kernel,
        out_shape=jax.ShapeDtypeStruct((b_pad, opad), jnp.float32),
        grid_spec=pltpu.PrefetchScalarGridSpec(
            num_scalar_prefetch=0,
            grid=grid,
            in_specs=[
                pl.BlockSpec((tile_b, in_dim), lambda i: (i, 0)),   # x tile (pipelined)
                pl.BlockSpec((in_dim, hpad), lambda i: (0, 0)),     # W1 (resident)
                pl.BlockSpec((1, hpad), lambda i: (0, 0)),          # b1
                pl.BlockSpec((hpad, hpad), lambda i: (0, 0)),       # W2
                pl.BlockSpec((1, hpad), lambda i: (0, 0)),          # b2
                pl.BlockSpec((hpad, opad), lambda i: (0, 0)),       # W3
                pl.BlockSpec((1, opad), lambda i: (0, 0)),          # b3
            ],
            out_specs=pl.BlockSpec((tile_b, opad), lambda i: (i, 0)),
        ),
        compiler_params=pltpu.CompilerParams(
            dimension_semantics=("parallel",),          # 2 TCs on v7x
            vmem_limit_bytes=32 * 1024 * 1024,          # safe on v5e/v6e/v7x
        ),
    )(x2d, w1, b1, w2, b2, w3, b3)

    # Drop batch padding and lane padding (padded columns are exactly 0).
    return out[:B, :out_dim]


def init_params(key, size):
    """Deterministic init mimicking nn.Linear's U(-1/sqrt(fan_in), 1/sqrt(fan_in))."""
    def linear(key, fan_in, fan_out):
        kw, kb = jax.random.split(key)
        bound = 1.0 / jnp.sqrt(fan_in)
        w = jax.random.uniform(kw, (fan_in, fan_out), jnp.float32, -bound, bound)
        b = jax.random.uniform(kb, (1, fan_out), jnp.float32, -bound, bound)
        return w, b

    k1, k2, k3 = jax.random.split(key, 3)
    w1, b1 = linear(k1, 28 * 28, size)
    w2, b2 = linear(k2, size, size)
    w3, b3 = linear(k3, size, 10)
    return (w1, b1, w2, b2, w3, b3)


def reference_forward(x, params):
    w1, b1, w2, b2, w3, b3 = params
    h = x.reshape(x.shape[0], -1)
    h = jnp.maximum(h @ w1 + b1, 0.0)
    h = jnp.maximum(h @ w2 + b2, 0.0)
    return jnp.maximum(h @ w3 + b3, 0.0)


if __name__ == "__main__":
    size = 32          # hidden width of the MLP
    batch = 2
    key = jax.random.PRNGKey(0)
    kx, kp = jax.random.split(key)

    x = jax.random.normal(kx, (batch, 28, 28), dtype=jnp.float32)
    params = init_params(kp, size)

    out = neural_network_forward(x, params, hidden=size)
    out = jax.block_until_ready(out)

    ref = reference_forward(x, params)
    assert out.shape == (batch, 10)
    assert jnp.allclose(out, ref, atol=1e-5, rtol=1e-5)
    print("KERNEL_OK")
</pallas_src>

<mosaic_0001>
module attributes {stable_mosaic.version = 11 : i64} {
  func.func @mlp_kernel(%arg0: i32, %arg1: memref<8x784xf32, #tpu.memory_space<vmem>>, %arg2: memref<784x128xf32, #tpu.memory_space<vmem>>, %arg3: memref<1x128xf32, #tpu.memory_space<vmem>>, %arg4: memref<128x128xf32, #tpu.memory_space<vmem>>, %arg5: memref<1x128xf32, #tpu.memory_space<vmem>>, %arg6: memref<128x128xf32, #tpu.memory_space<vmem>>, %arg7: memref<1x128xf32, #tpu.memory_space<vmem>>, %arg8: memref<8x128xf32, #tpu.memory_space<vmem>>) attributes {dimension_semantics = [#tpu.dimension_semantics<parallel>], iteration_bounds = array<i64: 1>, scalar_prefetch = 0 : i64, scratch_operands = 0 : i64, tpu.core_type = #tpu.core_type<tc>, window_params = [{transform_indices = @transform_0, window_bounds = array<i64: 8, 784>}, {pipeline_mode = #tpu.pipeline_mode<synchronous>, transform_indices = @transform_1, window_bounds = array<i64: 784, 128>}, {pipeline_mode = #tpu.pipeline_mode<synchronous>, transform_indices = @transform_2, window_bounds = array<i64: 1, 128>}, {pipeline_mode = #tpu.pipeline_mode<synchronous>, transform_indices = @transform_3, window_bounds = array<i64: 128, 128>}, {pipeline_mode = #tpu.pipeline_mode<synchronous>, transform_indices = @transform_4, window_bounds = array<i64: 1, 128>}, {pipeline_mode = #tpu.pipeline_mode<synchronous>, transform_indices = @transform_5, window_bounds = array<i64: 128, 128>}, {pipeline_mode = #tpu.pipeline_mode<synchronous>, transform_indices = @transform_6, window_bounds = array<i64: 1, 128>}, {transform_indices = @transform_7, window_bounds = array<i64: 8, 128>}]} {
    %c0 = arith.constant 0 : index
    %c0_0 = arith.constant 0 : index
    %0 = vector.load %arg1[%c0, %c0_0] : memref<8x784xf32, #tpu.memory_space<vmem>>, vector<8x784xf32>
    %c0_1 = arith.constant 0 : index
    %c0_2 = arith.constant 0 : index
    %1 = vector.load %arg2[%c0_1, %c0_2] : memref<784x128xf32, #tpu.memory_space<vmem>>, vector<784x128xf32>
    %cst = arith.constant dense<0.000000e+00> : vector<8x128xf32>
    %2 = tpu.matmul %0, %1, %cst {dimension_numbers = #tpu.dot_dimension_numbers<[1], [0], [0], [1], [0, 0, 1, 1], [], []>} : vector<8x784xf32>, vector<784x128xf32>, vector<8x128xf32> -> vector<8x128xf32>
    %c0_3 = arith.constant 0 : index
    %c0_4 = arith.constant 0 : index
    %3 = vector.load %arg3[%c0_3, %c0_4] : memref<1x128xf32, #tpu.memory_space<vmem>>, vector<1x128xf32>
    %4 = vector.broadcast %3 : vector<1x128xf32> to vector<8x128xf32>
    %5 = arith.addf %2, %4 : vector<8x128xf32>
    %cst_5 = arith.constant 0.000000e+00 : f32
    %6 = vector.broadcast %cst_5 : f32 to vector<8x128xf32>
    %7 = arith.maximumf %5, %6 : vector<8x128xf32>
    %c0_6 = arith.constant 0 : index
    %c0_7 = arith.constant 0 : index
    %8 = vector.load %arg4[%c0_6, %c0_7] : memref<128x128xf32, #tpu.memory_space<vmem>>, vector<128x128xf32>
    %cst_8 = arith.constant dense<0.000000e+00> : vector<8x128xf32>
    %9 = tpu.matmul %7, %8, %cst_8 {dimension_numbers = #tpu.dot_dimension_numbers<[1], [0], [0], [1], [0, 0, 1, 1], [], []>} : vector<8x128xf32>, vector<128x128xf32>, vector<8x128xf32> -> vector<8x128xf32>
    %c0_9 = arith.constant 0 : index
    %c0_10 = arith.constant 0 : index
    %10 = vector.load %arg5[%c0_9, %c0_10] : memref<1x128xf32, #tpu.memory_space<vmem>>, vector<1x128xf32>
    %11 = vector.broadcast %10 : vector<1x128xf32> to vector<8x128xf32>
    %12 = arith.addf %9, %11 : vector<8x128xf32>
    %cst_11 = arith.constant 0.000000e+00 : f32
    %13 = vector.broadcast %cst_11 : f32 to vector<8x128xf32>
    %14 = arith.maximumf %12, %13 : vector<8x128xf32>
    %c0_12 = arith.constant 0 : index
    %c0_13 = arith.constant 0 : index
    %15 = vector.load %arg6[%c0_12, %c0_13] : memref<128x128xf32, #tpu.memory_space<vmem>>, vector<128x128xf32>
    %cst_14 = arith.constant dense<0.000000e+00> : vector<8x128xf32>
    %16 = tpu.matmul %14, %15, %cst_14 {dimension_numbers = #tpu.dot_dimension_numbers<[1], [0], [0], [1], [0, 0, 1, 1], [], []>} : vector<8x128xf32>, vector<128x128xf32>, vector<8x128xf32> -> vector<8x128xf32>
    %c0_15 = arith.constant 0 : index
    %c0_16 = arith.constant 0 : index
    %17 = vector.load %arg7[%c0_15, %c0_16] : memref<1x128xf32, #tpu.memory_space<vmem>>, vector<1x128xf32>
    %18 = vector.broadcast %17 : vector<1x128xf32> to vector<8x128xf32>
    %19 = arith.addf %16, %18 : vector<8x128xf32>
    %cst_17 = arith.constant 0.000000e+00 : f32
    %20 = vector.broadcast %cst_17 : f32 to vector<8x128xf32>
    %21 = arith.maximumf %19, %20 : vector<8x128xf32>
    %c0_18 = arith.constant 0 : index
    %c0_19 = arith.constant 0 : index
    %22 = vector.load %arg8[%c0_18, %c0_19] : memref<8x128xf32, #tpu.memory_space<vmem>>, vector<8x128xf32>
    tpu.vector_store %arg8[%c0_18, %c0_19], %21 {strides = array<i32>} : memref<8x128xf32, #tpu.memory_space<vmem>>, vector<8x128xf32>,
    return
  }
  func.func @transform_0(%arg0: i32) -> (i32, i32) {
    %c0_i32 = arith.constant 0 : i32
    %c0_i32_0 = arith.constant 0 : i32
    return %arg0, %c0_i32 : i32, i32
  }
  func.func @transform_1(%arg0: i32) -> (i32, i32) {
    %c0_i32 = arith.constant 0 : i32
    %c0_i32_0 = arith.constant 0 : i32
    %c0_i32_1 = arith.constant 0 : i32
    return %c0_i32, %c0_i32_0 : i32, i32
  }
  func.func @transform_2(%arg0: i32) -> (i32, i32) {
    %c0_i32 = arith.constant 0 : i32
    %c0_i32_0 = arith.constant 0 : i32
    %c0_i32_1 = arith.constant 0 : i32
    return %c0_i32, %c0_i32_0 : i32, i32
  }
  func.func @transform_3(%arg0: i32) -> (i32, i32) {
    %c0_i32 = arith.constant 0 : i32
    %c0_i32_0 = arith.constant 0 : i32
    %c0_i32_1 = arith.constant 0 : i32
    return %c0_i32, %c0_i32_0 : i32, i32
  }
  func.func @transform_4(%arg0: i32) -> (i32, i32) {
    %c0_i32 = arith.constant 0 : i32
    %c0_i32_0 = arith.constant 0 : i32
    %c0_i32_1 = arith.constant 0 : i32
    return %c0_i32, %c0_i32_0 : i32, i32
  }
  func.func @transform_5(%arg0: i32) -> (i32, i32) {
    %c0_i32 = arith.constant 0 : i32
    %c0_i32_0 = arith.constant 0 : i32
    %c0_i32_1 = arith.constant 0 : i32
    return %c0_i32, %c0_i32_0 : i32, i32
  }
  func.func @transform_6(%arg0: i32) -> (i32, i32) {
    %c0_i32 = arith.constant 0 : i32
    %c0_i32_0 = arith.constant 0 : i32
    %c0_i32_1 = arith.constant 0 : i32
    return %c0_i32, %c0_i32_0 : i32, i32
  }
  func.func @transform_7(%arg0: i32) -> (i32, i32) {
    %c0_i32 = arith.constant 0 : i32
    %c0_i32_0 = arith.constant 0 : i32
    return %arg0, %c0_i32 : i32, i32
  }
}

</mosaic_0001>

<bundles_post_ra>
// kernel: neural_network_forward.1
= control target key start
LH: loop header
LB: loop body
LE: loop exit
PB: predicated region body
PF: predicated region fallthrough
CT: control target
= control target key end

     0   :  { %vm138_vm0 = vcmask 130048   ;;  %vm842_vm1 = vmmov 0   ;;  %s1346_s1 = inlined_call_operand.vmem [shape: f32[784,128], index: 1, kind: input, shape index: {}]   ;;  %s1347_s0 = inlined_call_operand.vmem [shape: f32[8,784], index: 0, kind: input, shape index: {}]   ;;  %s1348_s3 = inlined_call_operand.vmem [shape: f32[128,128], index: 3, kind: input, shape index: {}]   ;;  %s1349_s5 = inlined_call_operand.vmem [shape: f32[128,128], index: 5, kind: input, shape index: {}]   ;;  %s1350_s2 = inlined_call_operand.vmem [shape: f32[1,128], index: 2, kind: input, shape index: {}]   ;;  %s1351_s4 = inlined_call_operand.vmem [shape: f32[1,128], index: 4, kind: input, shape index: {}]   ;;  %s1352_s6 = inlined_call_operand.vmem [shape: f32[1,128], index: 6, kind: input, shape index: {}]   ;;  %s1353_s7 = inlined_call_operand.vmem [shape: f32[8,128], index: 7, kind: output, shape index: {}]  }
   0x1   :  { %v64_v0 = vld [vmem:[%s1346_s1 + $0xf8] sm:$0xff]  ;;  %v63_v2 = vld [vmem:[%s1346_s1 + $0xf0] sm:$0xff]  ;;  %v62_v6 = vld [vmem:[%s1346_s1 + $0xe8] sm:$0xff] }
   0x2   :  { %v48_v1 = vld [vmem:[%s1346_s1 + $0x78] sm:$0xff]  ;;  %620 = vmatprep.subr.mxu0 %v64_v0  ;;  %v47_v4 = vld [vmem:[%s1346_s1 + $0x70] sm:$0xff]  ;;  %v46_v8 = vld [vmem:[%s1346_s1 + $0x68] sm:$0xff] }
   0x3   :  { %v96_v3 = vld [vmem:[%s1346_s1 + $0x1f8] sm:$0xff]  ;;  %621 = vmatpush3.msra.mxu0 %v48_v1  ;;  %v95_v7 = vld [vmem:[%s1346_s1 + $0x1f0] sm:$0xff]  ;;  %v94_v10 = vld [vmem:[%s1346_s1 + $0x1e8] sm:$0xff] }
   0x4   :  { %v80_v5 = vld [vmem:[%s1346_s1 + $0x178] sm:$0xff]  ;;  %655 = vmatprep.subr.mxu1 %v96_v3  ;;  %622 = vmatprep.subr.mxu0 %v63_v2  ;;  %v79_v9 = vld [vmem:[%s1346_s1 + $0x170] sm:$0xff]  ;;  %v61_v11 = vld [vmem:[%s1346_s1 + $0xe0] sm:$0xff] }
   0x5   :  { %656 = vmatpush3.msra.mxu1 %v80_v5  ;;  %623 = vmatpush3.msra.mxu0 %v47_v4  ;;  %v78_v12 = vld [vmem:[%s1346_s1 + $0x168] sm:$0xff]  ;;  %v45_v13 = vld [vmem:[%s1346_s1 + $0x60] sm:$0xff]  ;;  %v60_v15 = vld [vmem:[%s1346_s1 + $0xd8] sm:$0xff] }
   0x6   :  { %657 = vmatprep.subr.mxu1 %v95_v7  ;;  %624 = vmatprep.subr.mxu0 %v62_v6  ;;  %v93_v14 = vld [vmem:[%s1346_s1 + $0x1e0] sm:$0xff]  ;;  %v44_v17 = vld [vmem:[%s1346_s1 + $0x58] sm:$0xff]  ;;  %v59_v19 = vld [vmem:[%s1346_s1 + $0xd0] sm:$0xff] }
   0x7   :  { %658 = vmatpush3.msra.mxu1 %v79_v9  ;;  %625 = vmatpush3.msra.mxu0 %v46_v8  ;;  %v77_v16 = vld [vmem:[%s1346_s1 + $0x160] sm:$0xff]  ;;  %v92_v18 = vld [vmem:[%s1346_s1 + $0x1d8] sm:$0xff]  ;;  %v43_v21 = vld [vmem:[%s1346_s1 + $0x50] sm:$0xff] }
   0x8   :  { %659 = vmatprep.subr.mxu1 %v94_v10  ;;  %626 = vmatprep.subr.mxu0 %v61_v11  ;;  %v76_v20 = vld [vmem:[%s1346_s1 + $0x158] sm:$0xff]  ;;  %v91_v22 = vld [vmem:[%s1346_s1 + $0x1d0] sm:$0xff]  ;;  %v58_v23 = vld [vmem:[%s1346_s1 + $0xc8] sm:$0xff] }
   0x9   :  { %660 = vmatpush3.msra.mxu1 %v78_v12  ;;  %627 = vmatpush3.msra.mxu0 %v45_v13  ;;  %v75_v24 = vld [vmem:[%s1346_s1 + $0x150] sm:$0xff]  ;;  %v42_v25 = vld [vmem:[%s1346_s1 + $0x48] sm:$0xff]  ;;  %v57_v27 = vld [vmem:[%s1346_s1 + $0xc0] sm:$0xff] }
   0xa   :  { %661 = vmatprep.subr.mxu1 %v93_v14  ;;  %628 = vmatprep.subr.mxu0 %v60_v15  ;;  %v90_v26 = vld [vmem:[%s1346_s1 + $0x1c8] sm:$0xff]  ;;  %v41_v29 = vld [vmem:[%s1346_s1 + $0x40] sm:$0xff]  ;;  %v56_v31 = vld [vmem:[%s1346_s1 + $0xb8] sm:$0xff]  ;;  %v841_v14 = vmov 0.0  }
   0xb   :  { %662 = vmatpush3.msra.mxu1 %v77_v16  ;;  %629 = vmatpush3.msra.mxu0 %v44_v17  ;;  %v74_v28 = vld [vmem:[%s1346_s1 + $0x148] sm:$0xff]  ;;  %v89_v30 = vld [vmem:[%s1346_s1 + $0x1c0] sm:$0xff]  ;;  %v40_v33 = vld [vmem:[%s1346_s1 + $0x38] sm:$0xff] }
   0xc   :  { %663 = vmatprep.subr.mxu1 %v92_v18  ;;  %630 = vmatprep.subr.mxu0 %v59_v19  ;;  %v73_v32 = vld [vmem:[%s1346_s1 + $0x140] sm:$0xff]  ;;  %v88_v34 = vld [vmem:[%s1346_s1 + $0x1b8] sm:$0xff]  ;;  %v55_v35 = vld [vmem:[%s1346_s1 + $0xb0] sm:$0xff] }
   0xd   :  { %664 = vmatpush3.msra.mxu1 %v76_v20  ;;  %631 = vmatpush3.msra.mxu0 %v43_v21  ;;  %v72_v36 = vld [vmem:[%s1346_s1 + $0x138] sm:$0xff]  ;;  %v39_v37 = vld [vmem:[%s1346_s1 + $0x30] sm:$0xff]  ;;  %v54_v39 = vld [vmem:[%s1346_s1 + $0xa8] sm:$0xff] }
   0xe   :  { %665 = vmatprep.subr.mxu1 %v91_v22  ;;  %632 = vmatprep.subr.mxu0 %v58_v23  ;;  %v87_v38 = vld [vmem:[%s1346_s1 + $0x1b0] sm:$0xff]  ;;  %v38_v41 = vld [vmem:[%s1346_s1 + $0x28] sm:$0xff]  ;;  %v53_v43 = vld [vmem:[%s1346_s1 + $0xa0] sm:$0xff] }
   0xf   :  { %666 = vmatpush3.msra.mxu1 %v75_v24  ;;  %633 = vmatpush3.msra.mxu0 %v42_v25  ;;  %v71_v40 = vld [vmem:[%s1346_s1 + $0x130] sm:$0xff]  ;;  %v86_v42 = vld [vmem:[%s1346_s1 + $0x1a8] sm:$0xff]  ;;  %v37_v45 = vld [vmem:[%s1346_s1 + $0x20] sm:$0xff] }
  0x10   :  { %667 = vmatprep.subr.mxu1 %v90_v26  ;;  %634 = vmatprep.subr.mxu0 %v57_v27  ;;  %v70_v44 = vld [vmem:[%s1346_s1 + $0x128] sm:$0xff]  ;;  %v85_v46 = vld [vmem:[%s1346_s1 + $0x1a0] sm:$0xff]  ;;  %v52_v47 = vld [vmem:[%s1346_s1 + $0x98] sm:$0xff] }
  0x11   :  { %668 = vmatpush3.msra.mxu1 %v74_v28  ;;  %635 = vmatpush3.msra.mxu0 %v41_v29  ;;  %v69_v48 = vld [vmem:[%s1346_s1 + $0x120] sm:$0xff]  ;;  %v36_v49 = vld [vmem:[%s1346_s1 + $0x18] sm:$0xff]  ;;  %v51_v51 = vld [vmem:[%s1346_s1 + $0x90] sm:$0xff] }
  0x12   :  { %669 = vmatprep.subr.mxu1 %v89_v30  ;;  %636 = vmatprep.subr.mxu0 %v56_v31  ;;  %v84_v50 = vld [vmem:[%s1346_s1 + $0x198] sm:$0xff]  ;;  %v35_v53 = vld [vmem:[%s1346_s1 + $0x10] sm:$0xff]  ;;  %v50_v55 = vld [vmem:[%s1346_s1 + $0x88] sm:$0xff] }
  0x13   :  { %670 = vmatpush3.msra.mxu1 %v73_v32  ;;  %637 = vmatpush3.msra.mxu0 %v40_v33  ;;  %v68_v52 = vld [vmem:[%s1346_s1 + $0x118] sm:$0xff]  ;;  %v83_v54 = vld [vmem:[%s1346_s1 + $0x190] sm:$0xff]  ;;  %v34_v57 = vld [vmem:[%s1346_s1 + $0x8] sm:$0xff] }
  0x14   :  { %671 = vmatprep.subr.mxu1 %v88_v34  ;;  %638 = vmatprep.subr.mxu0 %v55_v35  ;;  %v67_v56 = vld [vmem:[%s1346_s1 + $0x110] sm:$0xff]  ;;  %v82_v58 = vld [vmem:[%s1346_s1 + $0x188] sm:$0xff]  ;;  %v49_v59 = vld [vmem:[%s1346_s1 + $0x80] sm:$0xff] }
  0x15   :  { %672 = vmatpush3.msra.mxu1 %v72_v36  ;;  %639 = vmatpush3.msra.mxu0 %v39_v37  ;;  %v27_v60 = vld [vmem:[%s1347_s0 + $0x8] sm:$0xff]  ;;  %v33_v61 = vld [vmem:[%s1346_s1] sm:$0xff]  ;;  %v128_v1 = vld [vmem:[%s1346_s1 + $0x2f8] sm:$0xff] }
  0x16   :  { %673 = vmatprep.subr.mxu1 %v87_v38  ;;  %640 = vmatprep.subr.mxu0 %v54_v39  ;;  %v66_v62 = vld [vmem:[%s1346_s1 + $0x108] sm:$0xff]  ;;  %v26_v63 = vld [vmem:[%s1347_s0] sm:$0xff]  ;;  %v29_v3 = vld [vmem:[%s1347_s0 + $0x18] sm:$0xff] }
  0x17   :  { %674 = vmatpush3.msra.mxu1 %v71_v40  ;;  %641 = vmatpush3.msra.mxu0 %v38_v41  ;;  %v81_v0 = vld [vmem:[%s1346_s1 + $0x180] sm:$0xff]  ;;  %v112_v4 = vld [vmem:[%s1346_s1 + $0x278] sm:$0xff]  ;;  %v28_v5 = vld [vmem:[%s1347_s0 + $0x10] sm:$0xff] }
  0x18   :  { %675 = vmatprep.subr.mxu1 %v86_v42  ;;  %642 = vmatprep.subr.mxu0 %v53_v43  ;;  %v65_v2 = vld [vmem:[%s1346_s1 + $0x100] sm:$0xff]  ;;  %v127_v6 = vld [vmem:[%s1346_s1 + $0x2f0] sm:$0xff]  ;;  %v31_v8 = vld [vmem:[%s1347_s0 + $0x28] sm:$0xff] }
  0x19   :  { %676 = vmatpush3.msra.mxu1 %v70_v44  ;;  %643 = vmatpush3.msra.mxu0 %v37_v45  ;;  %v111_v7 = vld [vmem:[%s1346_s1 + $0x270] sm:$0xff]  ;;  %v126_v9 = vld [vmem:[%s1346_s1 + $0x2e8] sm:$0xff]  ;;  %v125_v12 = vld [vmem:[%s1346_s1 + $0x2e0] sm:$0xff] }
  0x1a   :  { %677 = vmatprep.subr.mxu1 %v85_v46  ;;  %644 = vmatprep.subr.mxu0 %v52_v47  ;;  %v110_v10 = vld [vmem:[%s1346_s1 + $0x268] sm:$0xff]  ;;  %v109_v13 = vld [vmem:[%s1346_s1 + $0x260] sm:$0xff]  ;;  %v124_v16 = vld [vmem:[%s1346_s1 + $0x2d8] sm:$0xff] }
  0x1b   :  { %678 = vmatpush3.msra.mxu1 %v69_v48  ;;  %645 = vmatpush3.msra.mxu0 %v36_v49  ;;  %v130_v11 = vld [vmem:[%s1346_s1 + $0x308] sm:$0xff]  ;;  %v129_v15 = vld [vmem:[%s1346_s1 + $0x300] sm:$0xff]  ;;  %v108_v17 = vld [vmem:[%s1346_s1 + $0x258] sm:$0xff] }
  0x1c   :  { %679 = vmatprep.subr.mxu1 %v84_v50  ;;  %646 = vmatprep.subr.mxu0 %v51_v51  ;;  %v32_v18 = vld [vmem:[%s1347_s0 + $0x30] sm:$0xff]  ;;  %v122_v21 = vld [vmem:[%s1346_s1 + $0x2c8] sm:$0xff]  ;;  %v121_v23 = vld [vmem:[%s1346_s1 + $0x2c0] sm:$0xff] }
  0x1d   :  { %680 = vmatpush3.msra.mxu1 %v68_v52  ;;  %647 = vmatpush3.msra.mxu0 %v35_v53  ;;  %v123_v19 = vld [vmem:[%s1346_s1 + $0x2d0] sm:$0xff]  ;;  %v106_v22 = vld [vmem:[%s1346_s1 + $0x248] sm:$0xff]  ;;  %v105_v24 = vld [vmem:[%s1346_s1 + $0x240] sm:$0xff] }
  0x1e   :  { %681 = vmatprep.subr.mxu1 %v83_v54  ;;  %648 = vmatprep.subr.mxu0 %v50_v55  ;;  %v107_v20 = vld [vmem:[%s1346_s1 + $0x250] sm:$0xff]  ;;  %v120_v25 = vld [vmem:[%s1346_s1 + $0x2b8] sm:$0xff]  ;;  %v118_v29 = vld [vmem:[%s1346_s1 + $0x2a8] sm:$0xff] }
  0x1f   :  { %682 = vmatpush3.msra.mxu1 %v67_v56  ;;  %649 = vmatpush3.msra.mxu0 %v34_v57  ;;  %v104_v26 = vld [vmem:[%s1346_s1 + $0x238] sm:$0xff]  ;;  %v119_v27 = vld [vmem:[%s1346_s1 + $0x2b0] sm:$0xff]  ;;  %v102_v30 = vld [vmem:[%s1346_s1 + $0x228] sm:$0xff] }
  0x20   :  { %683 = vmatprep.subr.mxu1 %v82_v58  ;;  %650 = vmatprep.subr.mxu0 %v49_v59  ;;  %v103_v28 = vld [vmem:[%s1346_s1 + $0x230] sm:$0xff]  ;;  %v117_v31 = vld [vmem:[%s1346_s1 + $0x2a0] sm:$0xff]  ;;  %v116_v33 = vld [vmem:[%s1346_s1 + $0x298] sm:$0xff] }
  0x21   :  { %206 = vmatprep.mubr.f32.mxu0 %v27_v60  ;;  %651 = vmatpush3.msra.mxu0 %v33_v61  ;;  %v101_v32 = vld [vmem:[%s1346_s1 + $0x220] sm:$0xff]  ;;  %v100_v34 = vld [vmem:[%s1346_s1 + $0x218] sm:$0xff]  ;;  %v115_v35 = vld [vmem:[%s1346_s1 + $0x290] sm:$0xff] }
  0x22   :  { %684 = vmatpush3.msra.mxu1 %v66_v62  ;;  %207 = vmatmul.mubr.f32.vlgmr.msra.gmra.mxu0 %v26_v63  ;;  %v99_v36 = vld [vmem:[%s1346_s1 + $0x210] sm:$0xff]  ;;  %v114_v37 = vld [vmem:[%s1346_s1 + $0x288] sm:$0xff]  ;;  %v113_v39 = vld [vmem:[%s1346_s1 + $0x280] sm:$0xff] }
  0x23   :  { %685 = vmatprep.subr.mxu1 %v81_v0  ;;  %690 = vmatprep.subr.mxu0 %v128_v1  ;;  %v98_v38 = vld [vmem:[%s1346_s1 + $0x208] sm:$0xff]  ;;  %v97_v40 = vld [vmem:[%s1346_s1 + $0x200] sm:$0xff]  ;;  %v438_v42 = vld [vmem:[%s1348_s3 + $0x78] sm:$0xff] }
  0x24   :  { %686 = vmatpush3.msra.mxu1 %v65_v2  ;;  %276 = vmatprep.mubr.f32.mxu1 %v29_v3  ;;  %v30_v41 = vld [vmem:[%s1347_s0 + $0x20] sm:$0xff]  ;;  %v437_v43 = vld [vmem:[%s1348_s3 + $0x70] sm:$0xff]  ;;  %v436_v44 = vld [vmem:[%s1348_s3 + $0x68] sm:$0xff] }
  0x25   :  { %691 = vmatpush3.msra.mxu0 %v112_v4  ;;  %277 = vmatmul.mubr.f32.vlgmr.msra.gmra.mxu1 %v28_v5  ;;  %v435_v45 = vld [vmem:[%s1348_s3 + $0x60] sm:$0xff]  ;;  %v434_v46 = vld [vmem:[%s1348_s3 + $0x58] sm:$0xff]  ;;  %v433_v47 = vld [vmem:[%s1348_s3 + $0x50] sm:$0xff] }
  0x26   :  { %692 = vmatprep.subr.mxu0 %v127_v6  ;;  %346 = vmatprep.mubr.f32.mxu0 %v31_v8  ;;  %v432_v48 = vld [vmem:[%s1348_s3 + $0x48] sm:$0xff]  ;;  %v431_v49 = vld [vmem:[%s1348_s3 + $0x40] sm:$0xff]  ;;  %v430_v50 = vld [vmem:[%s1348_s3 + $0x38] sm:$0xff] }
  0x27   :  { %693 = vmatpush3.msra.mxu0 %v111_v7  ;;  %762 = vmatprep.subr.mxu1 %v841_v14  ;;  %v429_v51 = vld [vmem:[%s1348_s3 + $0x30] sm:$0xff]  ;;  %v428_v52 = vld [vmem:[%s1348_s3 + $0x28] sm:$0xff]  ;;  %v427_v53 = vld [vmem:[%s1348_s3 + $0x20] sm:$0xff] }
  0x28   :  { %694 = vmatprep.subr.mxu0 %v126_v9  ;;  %763 = vmatpush3.msra.mxu1 %v130_v11  ;;  %v426_v54 = vld [vmem:[%s1348_s3 + $0x18] sm:$0xff]  ;;  %v425_v55 = vld [vmem:[%s1348_s3 + $0x10] sm:$0xff]  ;;  %v424_v56 = vld [vmem:[%s1348_s3 + $0x8] sm:$0xff] }
  0x29   :  { %695 = vmatpush3.msra.mxu0 %v110_v10  ;;  %764 = vmatprep.subr.mxu1 %v841_v14  ;;  %v423_v57 = vld [vmem:[%s1348_s3] sm:$0xff]  ;;  %v532_v58 = vld [vmem:[%s1349_s5 + $0x78] sm:$0xff]  ;;  %v531_v59 = vld [vmem:[%s1349_s5 + $0x70] sm:$0xff] }
  0x2a   :  { %696 = vmatprep.subr.mxu0 %v125_v12  ;;  %765 = vmatpush3.msra.mxu1 %v129_v15  ;;  %v530_v60 = vld [vmem:[%s1349_s5 + $0x68] sm:$0xff]  ;;  %v529_v61 = vld [vmem:[%s1349_s5 + $0x60] sm:$0xff]  ;;  %v528_v62 = vld [vmem:[%s1349_s5 + $0x58] sm:$0xff] }
  0x2b   :  { %697 = vmatpush3.msra.mxu0 %v109_v13  ;;  %766 = vmatprep.mubr.msk.f32.mxu1 %vm842_vm1, %v841_v14  ;;  %v527_v63 = vld [vmem:[%s1349_s5 + $0x50] sm:$0xff]  ;;  %v526_v0 = vld [vmem:[%s1349_s5 + $0x48] sm:$0xff]  ;;  %v525_v1 = vld [vmem:[%s1349_s5 + $0x40] sm:$0xff] }
  0x2c   :  { %698 = vmatprep.subr.mxu0 %v124_v16  ;;  %767 = vmatmul.mubr.msk.f32.vlgmr.msra.gmra.mxu1 %vm138_vm0, %v32_v18  ;;  %v524_v2 = vld [vmem:[%s1349_s5 + $0x38] sm:$0xff]  ;;  %v523_v3 = vld [vmem:[%s1349_s5 + $0x30] sm:$0xff]  ;;  %v522_v4 = vld [vmem:[%s1349_s5 + $0x28] sm:$0xff] }
  0x2d   :  { %699 = vmatpush3.msra.mxu0 %v108_v17  ;;  %769 = vmatprep.subr.mxu1 %v841_v14  ;;  %v521_v5 = vld [vmem:[%s1349_s5 + $0x20] sm:$0xff]  ;;  %v520_v6 = vld [vmem:[%s1349_s5 + $0x18] sm:$0xff] }
  0x2e   :  { %700 = vmatprep.subr.mxu0 %v123_v19  ;;  %801 = vmatprep.mubr.msk.f32.mxu1 %vm842_vm1, %v841_v14  ;;  %v616_v15 = vld [vmem:[%s1350_s2] ss:$0 sm:$0xff] }
  0x2f   :  { %701 = vmatpush3.msra.mxu0 %v107_v20  ;;  %770 = vmatpush3.msra.mxu1 %v438_v42 }
  0x30   :  { %702 = vmatprep.subr.mxu0 %v122_v21  ;;  %771 = vmatprep.subr.mxu1 %v841_v14 }
  0x31   :  { %703 = vmatpush3.msra.mxu0 %v106_v22  ;;  %772 = vmatpush3.msra.mxu1 %v437_v43 }
  0x32   :  { %704 = vmatprep.subr.mxu0 %v121_v23  ;;  %773 = vmatprep.subr.mxu1 %v841_v14 }
  0x33   :  { %705 = vmatpush3.msra.mxu0 %v105_v24  ;;  %774 = vmatpush3.msra.mxu1 %v436_v44 }
  0x34   :  { %706 = vmatprep.subr.mxu0 %v120_v25  ;;  %775 = vmatprep.subr.mxu1 %v841_v14  ;;  %v519_v25 = vld [vmem:[%s1349_s5 + $0x10] sm:$0xff] }
  0x35   :  { %707 = vmatpush3.msra.mxu0 %v104_v26  ;;  %776 = vmatpush3.msra.mxu1 %v435_v45  ;;  %v518_v26 = vld [vmem:[%s1349_s5 + $0x8] sm:$0xff] }
  0x36   :  { %708 = vmatprep.subr.mxu0 %v119_v27  ;;  %777 = vmatprep.subr.mxu1 %v841_v14  ;;  %v517_v27 = vld [vmem:[%s1349_s5] sm:$0xff] }
  0x37   :  { %709 = vmatpush3.msra.mxu0 %v103_v28  ;;  %778 = vmatpush3.msra.mxu1 %v434_v46  ;;  %v618_v28 = vld [vmem:[%s1351_s4] ss:$0 sm:$0xff] }
  0x38   :  { %710 = vmatprep.subr.mxu0 %v118_v29  ;;  %779 = vmatprep.subr.mxu1 %v841_v14 }
  0x39   :  { %711 = vmatpush3.msra.mxu0 %v102_v30  ;;  %780 = vmatpush3.msra.mxu1 %v433_v47 }
  0x3a   :  { %712 = vmatprep.subr.mxu0 %v117_v31  ;;  %781 = vmatprep.subr.mxu1 %v841_v14 }
  0x3b   :  { %713 = vmatpush3.msra.mxu0 %v101_v32  ;;  %782 = vmatpush3.msra.mxu1 %v432_v48 }
  0x3c   :  { %714 = vmatprep.subr.mxu0 %v116_v33  ;;  %783 = vmatprep.subr.mxu1 %v841_v14  ;;  %v619_v33 = vld [vmem:[%s1352_s6] ss:$0 sm:$0xff] }
  0x3d   :  { %715 = vmatpush3.msra.mxu0 %v100_v34  ;;  %784 = vmatpush3.msra.mxu1 %v431_v49 }
  0x3e   :  { %716 = vmatprep.subr.mxu0 %v115_v35  ;;  %785 = vmatprep.subr.mxu1 %v841_v14 }
  0x3f   :  { %717 = vmatpush3.msra.mxu0 %v99_v36  ;;  %786 = vmatpush3.msra.mxu1 %v430_v50 }
  0x40   :  { %718 = vmatprep.subr.mxu0 %v114_v37  ;;  %787 = vmatprep.subr.mxu1 %v841_v14 }
  0x41   :  { %719 = vmatpush3.msra.mxu0 %v98_v38  ;;  %788 = vmatpush3.msra.mxu1 %v429_v51 }
  0x42   :  { %720 = vmatprep.subr.mxu0 %v113_v39  ;;  %789 = vmatprep.subr.mxu1 %v841_v14 }
  0x43   :  { %721 = vmatpush3.msra.mxu0 %v97_v40  ;;  %790 = vmatpush3.msra.mxu1 %v428_v52 }
  0x44   :  { %347 = vmatmul.mubr.f32.vlgmr.msra.gmra.mxu0 %v30_v41  ;;  %804 = vmatprep.subr.mxu0 %v841_v14 }
  0x45   :  { %836 = vmatprep.mubr.msk.f32.mxu0 %vm842_vm1, %v841_v14  ;;  %791 = vmatprep.subr.mxu1 %v841_v14 }
  0x46   :  { %792 = vmatpush3.msra.mxu1 %v427_v53  ;;  %805 = vmatpush3.msra.mxu0 %v532_v58 }
  0x47   :  { %793 = vmatprep.subr.mxu1 %v841_v14  ;;  %806 = vmatprep.subr.mxu0 %v841_v14 }
  0x48   :  { %794 = vmatpush3.msra.mxu1 %v426_v54  ;;  %807 = vmatpush3.msra.mxu0 %v531_v59 }
  0x49   :  { %795 = vmatprep.subr.mxu1 %v841_v14  ;;  %808 = vmatprep.subr.mxu0 %v841_v14 }
  0x4a   :  { %796 = vmatpush3.msra.mxu1 %v425_v55  ;;  %809 = vmatpush3.msra.mxu0 %v530_v60 }
  0x4b   :  { %797 = vmatprep.subr.mxu1 %v841_v14  ;;  %810 = vmatprep.subr.mxu0 %v841_v14 }
  0x4c   :  { %798 = vmatpush3.msra.mxu1 %v424_v56  ;;  %811 = vmatpush3.msra.mxu0 %v529_v61 }
  0x4d   :  { %799 = vmatprep.subr.mxu1 %v841_v14  ;;  %812 = vmatprep.subr.mxu0 %v841_v14 }
  0x4e   :  { %800 = vmatpush3.msra.mxu1 %v423_v57  ;;  %813 = vmatpush3.msra.mxu0 %v528_v62 }
  0x4f   :  { %814 = vmatprep.subr.mxu0 %v841_v14 }
  0x50   :  { %815 = vmatpush3.msra.mxu0 %v527_v63 }
  0x51   :  { %816 = vmatprep.subr.mxu0 %v841_v14 }
  0x52   :  { %817 = vmatpush3.msra.mxu0 %v526_v0 }
  0x53   :  { %818 = vmatprep.subr.mxu0 %v841_v14 }
  0x54   :  { %819 = vmatpush3.msra.mxu0 %v525_v1 }
  0x55   :  { %820 = vmatprep.subr.mxu0 %v841_v14 }
  0x56   :  { %821 = vmatpush3.msra.mxu0 %v524_v2 }
  0x57   :  { %822 = vmatprep.subr.mxu0 %v841_v14 }
  0x58   :  { %823 = vmatpush3.msra.mxu0 %v523_v3 }
  0x59   :  { %824 = vmatprep.subr.mxu0 %v841_v14 }
  0x5a   :  { %825 = vmatpush3.msra.mxu0 %v522_v4 }
  0x5b   :  { %826 = vmatprep.subr.mxu0 %v841_v14 }
  0x5c   :  { %827 = vmatpush3.msra.mxu0 %v521_v5 }
  0x5d   :  { %828 = vmatprep.subr.mxu0 %v841_v14 }
  0x5e   :  { %829 = vmatpush3.msra.mxu0 %v520_v6 }
  0x5f   :  { %830 = vmatprep.subr.mxu0 %v841_v14 }
  0x60   :  { %831 = vmatpush3.msra.mxu0 %v519_v25 }
  0x61   :  { %832 = vmatprep.subr.mxu0 %v841_v14 }
  0x62   :  { %833 = vmatpush3.msra.mxu0 %v518_v26 }
  0x63   :  { %834 = vmatprep.subr.mxu0 %v841_v14 }
  0x64   :  { %835 = vmatpush3.msra.mxu0 %v517_v27 }
  0xe2   :  { %v652_v11 = vpop.f32.mrf.mxu0 }
  0xe4   :  { %v653_v12 = vpop.f32.mrf.mxu0 }
  0xe5   :  { %v687_v7 = vpop.f32.mrf.mxu1  ;;  %v654_v13 = vadd.f32 %v653_v12, %v652_v11 }
  0xe7   :  { %v688_v8 = vpop.f32.mrf.mxu1  ;;  %v209_v16 = vadd.f32 %v654_v13, %v616_v15 }
  0xe8   :  { %v689_v17 = vadd.f32 %v688_v8, %v687_v7 }
  0xea   :  { %v279_v20 = vadd.f32 %v689_v17, %v209_v16 }
  0xec   :  { %v418_v9 = vpop.f32.mrf.mxu1 }
  0xee   :  { %v768_v10 = vpop.f32.mrf.mxu1 }
 0x104   :  { %v722_v18 = vpop.f32.mrf.mxu0 }
 0x106   :  { %v723_v19 = vpop.f32.mrf.mxu0 }
 0x107   :  { %v724_v21 = vadd.f32 %v723_v19, %v722_v18 }
 0x109   :  { %v349_v22 = vadd.f32 %v724_v21, %v279_v20 }
 0x10b   :  { %v419_v23 = vadd.f32 %v418_v9, %v349_v22 }
 0x10d   :  { %v422_v24 = vmax.f32 %v419_v23, 0.0 }
 0x10f   :  { %802 = vmatmul.mubr.f32.vlgmr.msra.gmra.mxu1 %v422_v24 }
 0x1cf   :  { %v512_v29 = vpop.f32.mrf.mxu1 }
 0x1d0   :  { %v513_v30 = vadd.f32 %v618_v28, %v512_v29 }
 0x1d1   :  { %v803_v31 = vpop.f32.mrf.mxu1 }
 0x1d2   :  { %v516_v32 = vmax.f32 %v513_v30, 0.0 }
 0x1d4   :  { %837 = vmatmul.mubr.f32.vlgmr.msra.gmra.mxu0 %v516_v32 }
 0x294   :  { %v606_v34 = vpop.f32.mrf.mxu0 }
 0x295   :  { %v607_v14 = vadd.f32 %v619_v33, %v606_v34 }
 0x296   :  { %v838_v35 = vpop.f32.mrf.mxu0 }
 0x297   :  { %v610_v36 = vmax.f32 %v607_v14, 0.0 }
 0x299   :  { %611 = vst [vmem:[%s1353_s7] sm:$0xff] %v610_v36 }

</bundles_post_ra>
